<compile_context>
chip_gen: v6e
topology: v6e:2x2x1
jax: 0.10.0
libtpu: 0.0.40
codegen_flags: <defaults>
</compile_context>

<pallas_src>
import jax
import jax.numpy as jnp
from jax.experimental import pallas as pl
from jax.experimental.pallas import tpu as pltpu

_LANES = 128


def _round_up(a: int, m: int) -> int:
    return ((a + m - 1) // m) * m


def _sublane_multiple(dtype) -> int:
    itemsize = jnp.dtype(dtype).itemsize
    return {4: 8, 2: 16, 1: 32}.get(itemsize, 8)


def _linear_kernel(w_ref, b_ref, x_ref, o_ref):
    # w_ref, b_ref: (1,) f32 scalars in SMEM.
    # x_ref, o_ref: (tr, width) VMEM tiles (lane-dense, width % 128 == 0).
    w = w_ref[0]
    b = b_ref[0]
    xv = x_ref[...].astype(jnp.float32)
    o_ref[...] = (xv * w + b).astype(o_ref.dtype)


def linear_regression_v2(
    x,
    weight,
    bias,
    *,
    target_block_bytes=4 * 1024 * 1024,   # ~4 MiB blocks (good on v5e/v6e/v7x)
    max_lane_width=1024,
    min_pallas_elems=512 * 1024,          # below this, fixed overhead dominates
):
    """x: (..., 1); weight: (1, 1); bias: (1,) -> same shape/dtype as x."""
    orig_shape = x.shape
    dtype = x.dtype
    n = x.size  # in_features == 1, so total elements == batch size

    w32 = weight.reshape(()).astype(jnp.float32)
    b32 = bias.reshape(()).astype(jnp.float32)

    # Fast path: tiny inputs (kernel-launch / pipeline overhead dominates) or
    # sizes that are not a multiple of 128 (would need an extra HBM pad pass).
    # XLA fuses the scale-and-shift into a single read+write pass.
    if n < min_pallas_elems or n % _LANES != 0:
        y = (x.astype(jnp.float32) * w32 + b32).astype(dtype)
        return y.reshape(orig_shape)

    # Lane-dense slab geometry: pick the widest lane width (multiple of 128)
    # that divides n exactly -- no padding, the reshape is pure layout
    # plumbing of a contiguous flat array.  Prefer widths that also give at
    # least one full sublane group of rows.
    sub = _sublane_multiple(dtype)
    itemsize = jnp.dtype(dtype).itemsize
    width = _LANES
    for cand in range(max_lane_width, _LANES - 1, -_LANES):
        if n % cand == 0 and (n // cand) >= sub:
            width = cand
            break
    else:
        for cand in range(max_lane_width, _LANES - 1, -_LANES):
            if n % cand == 0:
                width = cand
                break
    rows = n // width

    # Row-block size: ~target_block_bytes per tile, multiple of the sublane
    # packing factor, never (much) larger than the array itself.
    tr_target = max(sub, (target_block_bytes // (width * itemsize)) // sub * sub)
    tr = min(tr_target, _round_up(rows, sub))
    grid_rows = pl.cdiv(rows, tr)  # ragged last block is masked by Pallas

    x2d = x.reshape(rows, width)   # contiguous reshape: no pad, no extra pass

    # Scalar params -> SMEM (f32 so the affine math matches PyTorch's f32).
    w_smem = w32.reshape(1)
    b_smem = b32.reshape(1)

    out2d = pl.pallas_call(
        _linear_kernel,
        out_shape=jax.ShapeDtypeStruct((rows, width), dtype),
        grid_spec=pltpu.PrefetchScalarGridSpec(
            num_scalar_prefetch=0,
            grid=(grid_rows,),
            in_specs=[
                pl.BlockSpec(memory_space=pltpu.MemorySpace.SMEM),  # weight
                pl.BlockSpec(memory_space=pltpu.MemorySpace.SMEM),  # bias
                pl.BlockSpec((tr, width), lambda i: (i, 0)),        # x tile
            ],
            out_specs=pl.BlockSpec((tr, width), lambda i: (i, 0)),
        ),
        compiler_params=pltpu.CompilerParams(
            # Independent row tiles -> shard across v7x's 2 TensorCores
            # (neutral on single-TC v5e/v6e).
            dimension_semantics=("parallel",),
            # 4 MiB tiles: 2x(in) + 2x(out) double buffers = 16 MiB + headroom;
            # safe under v5e/v6e/v7x scoped-VMEM limits.
            vmem_limit_bytes=32 * 1024 * 1024,
        ),
    )(w_smem, b_smem, x2d)

    return out2d.reshape(orig_shape)


if __name__ == "__main__":
    key = jax.random.PRNGKey(0)
    kx, kw, kb, kx2 = jax.random.split(key, 4)

    # Parameters matching nn.Linear(1, 1): weight (1, 1), bias (1,)
    weight = jax.random.normal(kw, (1, 1), dtype=jnp.float32)
    bias = jax.random.normal(kb, (1,), dtype=jnp.float32)

    # Batch of scalar features [B, 1]; B chosen so the Pallas kernel path is
    # exercised (force it with min_pallas_elems=0).
    x = jax.random.normal(kx, (2048, 1), dtype=jnp.float32)
    y = linear_regression_v2(x, weight, bias, min_pallas_elems=0)
    y = jax.block_until_ready(y)

    y_ref = x @ weight.T + bias
    assert y.shape == x.shape
    assert y.dtype == x.dtype
    assert jnp.allclose(y, y_ref, atol=1e-6), "pallas path mismatch vs reference"

    # Also check the small-batch fast path (default thresholds).
    x_small = jax.random.normal(kx2, (8, 1), dtype=jnp.float32)
    y_small = jax.block_until_ready(linear_regression_v2(x_small, weight, bias))
    y_small_ref = x_small @ weight.T + bias
    assert jnp.allclose(y_small, y_small_ref, atol=1e-6), "fast path mismatch"

    print("KERNEL_OK")
</pallas_src>

<mosaic_0001>
module attributes {stable_mosaic.version = 11 : i64} {
  func.func @_linear_kernel(%arg0: i32, %arg1: memref<1xf32, #tpu.memory_space<smem>>, %arg2: memref<1xf32, #tpu.memory_space<smem>>, %arg3: memref<8x256xf32, #tpu.memory_space<vmem>>, %arg4: memref<8x256xf32, #tpu.memory_space<vmem>>) attributes {dimension_semantics = [#tpu.dimension_semantics<parallel>], iteration_bounds = array<i64: 1>, scalar_prefetch = 0 : i64, scratch_operands = 0 : i64, tpu.core_type = #tpu.core_type<tc>, window_params = [{transform_indices = @transform_0, window_bounds = array<i64: 1>}, {transform_indices = @transform_1, window_bounds = array<i64: 1>}, {transform_indices = @transform_2, window_bounds = array<i64: 8, 256>}, {transform_indices = @transform_3, window_bounds = array<i64: 8, 256>}]} {
    %c0 = arith.constant 0 : index
    %0 = memref.load %arg1[%c0] : memref<1xf32, #tpu.memory_space<smem>>
    %c0_0 = arith.constant 0 : index
    %1 = memref.load %arg2[%c0_0] : memref<1xf32, #tpu.memory_space<smem>>
    %c0_1 = arith.constant 0 : index
    %c0_2 = arith.constant 0 : index
    %2 = vector.load %arg3[%c0_1, %c0_2] : memref<8x256xf32, #tpu.memory_space<vmem>>, vector<8x256xf32>
    %3 = vector.broadcast %0 : f32 to vector<8x256xf32>
    %4 = arith.mulf %2, %3 : vector<8x256xf32>
    %5 = vector.broadcast %1 : f32 to vector<8x256xf32>
    %6 = arith.addf %4, %5 : vector<8x256xf32>
    %c0_3 = arith.constant 0 : index
    %c0_4 = arith.constant 0 : index
    %7 = vector.load %arg4[%c0_3, %c0_4] : memref<8x256xf32, #tpu.memory_space<vmem>>, vector<8x256xf32>
    tpu.vector_store %arg4[%c0_3, %c0_4], %6 {strides = array<i32>} : memref<8x256xf32, #tpu.memory_space<vmem>>, vector<8x256xf32>,
    return
  }
  func.func @transform_0(%arg0: i32) -> i32 {
    %c0_i32 = arith.constant 0 : i32
    %c0_i32_0 = arith.constant 0 : i32
    return %c0_i32 : i32
  }
  func.func @transform_1(%arg0: i32) -> i32 {
    %c0_i32 = arith.constant 0 : i32
    %c0_i32_0 = arith.constant 0 : i32
    return %c0_i32 : i32
  }
  func.func @transform_2(%arg0: i32) -> (i32, i32) {
    %c0_i32 = arith.constant 0 : i32
    %c0_i32_0 = arith.constant 0 : i32
    return %arg0, %c0_i32 : i32, i32
  }
  func.func @transform_3(%arg0: i32) -> (i32, i32) {
    %c0_i32 = arith.constant 0 : i32
    %c0_i32_0 = arith.constant 0 : i32
    return %arg0, %c0_i32 : i32, i32
  }
}

</mosaic_0001>

<bundles_post_ra>
// kernel: tpu_custom_call.1
= control target key start
LH: loop header
LB: loop body
LE: loop exit
PB: predicated region body
PF: predicated region fallthrough
CT: control target
= control target key end

     0   :  { %10 = vsyncpa [#allocation5], 0  ;;  %s136_s0 = inlined_call_operand.<no memory space> [shape: f32[1], index: 0, kind: input, shape index: {}]   ;;  %s137_s1 = inlined_call_operand.<no memory space> [shape: f32[1], index: 1, kind: input, shape index: {}]   ;;  %s138_s2 = inlined_call_operand.hbm [shape: f32[8,256], index: 2, kind: input, shape index: {}]   ;;  %s139_s3 = inlined_call_operand.hbm [shape: f32[8,256], index: 3, kind: output, shape index: {}]  }
   0x1   :  { %11 = vsyncpa [#allocation6], 0  ;;  %s102_s12 = smov [#allocation4]  }
   0x2   :  { %s22_s13 = sshll.u32 %s102_s12, 4  ;;  %s23_s13 = int_to_ptr.vmem [resolvable:$true] %s22_s13 }
   0x3   :  { %s66_s14 = scalar_lea.vmem %s23_s13, 256  ;;  %p71_p1 = scmp.lt.s32.totalorder %s23_s13, %s23_s13 }
   0x4   :  { %p67_p0 = scmp.ne.s32.totalorder %s23_s13, %s66_s14  ;;  %p72_p2 = scmp.lt.s32.totalorder %s66_s14, %s66_s14 }
   0x6   :  { %p73_p3 = por %p72_p2, %p71_p1 }
   0x8   :  { %p74_p4 = pnand %p73_p3, %p67_p0 }
   0xa   :  { %77 = shalt.err (!%p74_p4)
}
   0xb   :  { %25 = dma.hbm_to_vmem [thread:$0]  %s138_s2, 256, %s23_s13, [#allocation5]  }
   0xc   :  { %98 = dma.done.wait [#allocation5], 256  }
   0xd   :  { %99 = vsyncadd [#allocation5], 4294967040  ;;  %v33_v0 = vstv %s136_s0  ;;  %v31_v1 = vld [vmem:[#allocation4] sm:$0xff]  ;;  %v36_v2 = vstv %s137_s1  ;;  %v32_v3 = vld [vmem:[#allocation4 + $0x8] sm:$0xff]  ;;  %s103_s21 = smov [#allocation7]  }
   0xe   :  { %s47_s22 = sshll.u32 %s103_s21, 4  ;;  %v34_v4 = vmul.f32 %v33_v0, %v31_v1  ;;  %v35_v5 = vmul.f32 %v33_v0, %v32_v3  ;;  %s48_s22 = int_to_ptr.vmem [resolvable:$true] %s47_s22 }
   0xf   :  { %s78_s2 = scalar_lea.vmem %s48_s22, 256  ;;  %p83_p6 = scmp.lt.s32.totalorder %s48_s22, %s48_s22 }
  0x10   :  { %v37_v6 = vadd.f32 %v36_v2, %v34_v4  ;;  %v38_v7 = vadd.f32 %v36_v2, %v35_v5  ;;  %p79_p5 = scmp.ne.s32.totalorder %s48_s22, %s78_s2  ;;  %p84_p7 = scmp.lt.s32.totalorder %s78_s2, %s78_s2 }
  0x12   :  { %39 = vst [vmem:[#allocation7] sm:$0xff] %v37_v6  ;;  %40 = vst [vmem:[#allocation7 + $0x8] sm:$0xff] %v38_v7  ;;  %p85_p8 = por %p84_p7, %p83_p6 }
  0x14   :  { %p86_p9 = pnand %p85_p8, %p79_p5 }
  0x16   :  { %89 = shalt.err (!%p86_p9)
}
  0x17   :  { %50 = dma.vmem_to_hbm [thread:$0]  %s48_s22, 256, %s139_s3, [#allocation6]  }
  0x18   :  { %100 = dma.done.wait [#allocation6], 256  }
  0x19   :  { %101 = vsyncadd [#allocation6], 4294967040 }
  0x1a   :  { %54 = vsyncpa [#allocation5], 1 }
  0x1b   :  { %55 = vsyncpa [#allocation6], 1 }

</bundles_post_ra>
